<compile_context>
chip_gen: v5e
topology: v5e:2x2
jax: 0.10.0
libtpu: 0.0.40
codegen_flags: <defaults>
</compile_context>

<pallas_src>
import jax
import jax.numpy as jnp
from jax.experimental import pallas as pl
from jax.experimental.pallas import tpu as pltpu


def _round_up(x, m):
    return ((x + m - 1) // m) * m


def _vmem_capacity_bytes():
    try:
        return int(pltpu.get_tpu_info().vmem_capacity_bytes)
    except Exception:
        return 64 * 1024 * 1024  # conservative fallback (v7x per-TC VMEM)


def _mlp_kernel(x_ref, w1_ref, b1_ref, w2_ref, b2_ref, o_ref):
    # Cast x to bf16 in-kernel (VPU) right before feeding the MXU; no extra
    # HBM round-trip in the wrapper.
    x_bf = x_ref[...].astype(jnp.bfloat16)
    # fc1 on the MXU: bf16 operands, f32 accumulation; bias + ReLU in f32 (VPU).
    h = jnp.dot(x_bf, w1_ref[...], preferred_element_type=jnp.float32)
    h = jnp.maximum(h + b1_ref[...], 0.0)
    # fc2 on the MXU, then bias + sigmoid (EUP) and a lane-dense f32 store.
    z = jnp.dot(h.astype(jnp.bfloat16), w2_ref[...],
                preferred_element_type=jnp.float32)
    z = z + b2_ref[...]
    o_ref[...] = jax.nn.sigmoid(z).astype(o_ref.dtype)


def prepare_params(w1, b1, w2, b2):
    """One-time parameter preprocessing (hoisted out of the forward path).

    Pads hidden and output feature dims to multiples of 128 lanes and casts the
    weight matrices to bf16.  Zero-padded hidden columns give ReLU(0)=0
    activations hitting zero-padded w2 rows, so fc2 is exactly unchanged.
    Padded output columns (sigmoid(0)=0.5) are sliced off in the forward.
    """
    in_size, hidden = w1.shape
    out_size = w2.shape[1]
    hidden_p = _round_up(hidden, 128)
    out_p = _round_up(out_size, 128)

    w1_p = jnp.pad(w1, ((0, 0), (0, hidden_p - hidden))).astype(jnp.bfloat16)
    b1_p = jnp.pad(b1.reshape(1, -1),
                   ((0, 0), (0, hidden_p - hidden))).astype(jnp.float32)
    w2_p = jnp.pad(w2, ((0, hidden_p - hidden),
                        (0, out_p - out_size))).astype(jnp.bfloat16)
    b2_p = jnp.pad(b2.reshape(1, -1),
                   ((0, 0), (0, out_p - out_size))).astype(jnp.float32)

    return dict(w1=w1_p, b1=b1_p, w2=w2_p, b2=b2_p,
                in_size=in_size, hidden=hidden, hidden_p=hidden_p,
                out_size=out_size, out_p=out_p)


def multilabel_network_forward(x, params, *, block_b=512):
    """Fused MultilabelNetwork forward.  x: (B, input_size) f32 -> (B, output_size) f32."""
    in_size = params["in_size"]
    hidden_p = params["hidden_p"]
    out_size = params["out_size"]
    out_p = params["out_p"]
    w1, b1, w2, b2 = params["w1"], params["b1"], params["w2"], params["b2"]

    B = x.shape[0]
    assert x.shape[1] == in_size

    # Batch tile: multiple of 16 rows (bf16 sublane packing); small batches run
    # as a single grid step.
    tb = min(_round_up(B, 16), _round_up(block_b, 16))
    b_p = _round_up(B, tb)

    capacity = _vmem_capacity_bytes()
    budget = int(0.85 * capacity)

    def step_vmem(tb_, tn_):
        # 2x margin on resident weight blocks (in case the pipeline double-buffers them).
        weights = 2 * (in_size * hidden_p * 2 + hidden_p * tn_ * 2
                       + hidden_p * 4 + tn_ * 4)
        io = 2 * tb_ * in_size * 4 + 2 * tb_ * tn_ * 4     # double-buffered x / out tiles
        inter = tb_ * hidden_p * 6 + tb_ * tn_ * 4          # h (f32 + bf16), z (f32)
        return weights + io + inter

    # Output-feature tile: whole padded head when it fits VMEM, otherwise the
    # largest 128-multiple divisor that does (keeps v7x's 64 MiB happy for wide
    # multilabel heads without shrinking the batch tile).
    tn = 128
    for cand in (out_p, 4096, 2048, 1024, 512, 256):
        if cand <= out_p and out_p % cand == 0 and step_vmem(tb, cand) <= budget:
            tn = cand
            break
    while step_vmem(tb, tn) > budget and tb > 16:
        tb = max(16, _round_up(tb // 2, 16))
        b_p = _round_up(B, tb)

    x_p = x if b_p == B else jnp.pad(x, ((0, b_p - B), (0, 0)))

    grid = (b_p // tb, out_p // tn)

    flops = 2 * b_p * (in_size * hidden_p + hidden_p * out_p)
    bytes_accessed = (b_p * in_size * 4 + w1.size * 2 + w2.size * 2
                      + b1.size * 4 + b2.size * 4 + b_p * out_p * 4)
    cost = pl.CostEstimate(flops=flops,
                           transcendentals=b_p * out_p,
                           bytes_accessed=bytes_accessed)

    vmem_limit = int(min(budget, max(2 * step_vmem(tb, tn), 16 * 1024 * 1024)))

    out_full = pl.pallas_call(
        _mlp_kernel,
        out_shape=jax.ShapeDtypeStruct((b_p, out_p), jnp.float32),
        grid=grid,
        in_specs=[
            pl.BlockSpec((tb, in_size), lambda i, j: (i, 0)),         # x: batch-tiled
            pl.BlockSpec((in_size, hidden_p), lambda i, j: (0, 0)),   # w1: resident
            pl.BlockSpec((1, hidden_p), lambda i, j: (0, 0)),         # b1: resident
            pl.BlockSpec((hidden_p, tn), lambda i, j: (0, j)),        # w2: N-tiled
            pl.BlockSpec((1, tn), lambda i, j: (0, j)),               # b2: N-tiled
        ],
        out_specs=pl.BlockSpec((tb, tn), lambda i, j: (i, j)),
        compiler_params=pltpu.CompilerParams(
            dimension_semantics=("parallel", "parallel"),
            vmem_limit_bytes=vmem_limit,
        ),
        cost_estimate=cost,
    )(x_p, w1, b1, w2, b2)

    if b_p == B and out_p == out_size:
        return out_full
    return out_full[:B, :out_size]


def reference_forward(x, w1, b1, w2, b2):
    h = jnp.maximum(x @ w1 + b1.reshape(1, -1), 0.0)
    return jax.nn.sigmoid(h @ w2 + b2.reshape(1, -1))


if __name__ == "__main__":
    # Small shapes consistent with the module: Linear(in, hidden) -> ReLU -> Linear(hidden, out) -> Sigmoid.
    B, input_size, hidden_size, output_size = 64, 16, 32, 8

    key = jax.random.PRNGKey(0)
    kx, kw1, kb1, kw2, kb2 = jax.random.split(key, 5)

    x = jax.random.normal(kx, (B, input_size), dtype=jnp.float32)

    # Deterministic PyTorch-style uniform(-1/sqrt(fan_in), 1/sqrt(fan_in)) init.
    lim1 = 1.0 / jnp.sqrt(jnp.float32(input_size))
    lim2 = 1.0 / jnp.sqrt(jnp.float32(hidden_size))
    w1 = jax.random.uniform(kw1, (input_size, hidden_size), jnp.float32, -lim1, lim1)
    b1 = jax.random.uniform(kb1, (hidden_size,), jnp.float32, -lim1, lim1)
    w2 = jax.random.uniform(kw2, (hidden_size, output_size), jnp.float32, -lim2, lim2)
    b2 = jax.random.uniform(kb2, (output_size,), jnp.float32, -lim2, lim2)

    # One-time parameter preprocessing (pad/cast hoisted out of the forward path).
    params = prepare_params(w1, b1, w2, b2)

    out = multilabel_network_forward(x, params)
    out = jax.block_until_ready(out)

    ref = reference_forward(x, w1, b1, w2, b2)
    assert out.shape == (B, output_size)
    # bf16 MXU operands vs f32 reference -> loosened tolerance.
    # TODO(synk): offer an f32-operand MXU path if strict parity with PyTorch f32 is required.
    assert jnp.allclose(out, ref, atol=2e-2, rtol=2e-2), float(jnp.max(jnp.abs(out - ref)))

    print("KERNEL_OK")
</pallas_src>

<mosaic_0001>
module attributes {stable_mosaic.version = 11 : i64} {
  func.func @_mlp_kernel(%arg0: i32, %arg1: i32, %arg2: memref<64x16xf32, #tpu.memory_space<vmem>>, %arg3: memref<16x128xbf16, #tpu.memory_space<vmem>>, %arg4: memref<1x128xf32, #tpu.memory_space<vmem>>, %arg5: memref<128x128xbf16, #tpu.memory_space<vmem>>, %arg6: memref<1x128xf32, #tpu.memory_space<vmem>>, %arg7: memref<64x128xf32, #tpu.memory_space<vmem>>) attributes {dimension_semantics = [#tpu.dimension_semantics<parallel>, #tpu.dimension_semantics<parallel>], iteration_bounds = array<i64: 1, 1>, scalar_prefetch = 0 : i64, scratch_operands = 0 : i64, tpu.core_type = #tpu.core_type<tc>, window_params = [{transform_indices = @transform_0, window_bounds = array<i64: 64, 16>}, {pipeline_mode = #tpu.pipeline_mode<synchronous>, transform_indices = @transform_1, window_bounds = array<i64: 16, 128>}, {pipeline_mode = #tpu.pipeline_mode<synchronous>, transform_indices = @transform_2, window_bounds = array<i64: 1, 128>}, {transform_indices = @transform_3, window_bounds = array<i64: 128, 128>}, {transform_indices = @transform_4, window_bounds = array<i64: 1, 128>}, {transform_indices = @transform_5, window_bounds = array<i64: 64, 128>}]} {
    %c0 = arith.constant 0 : index
    %c0_0 = arith.constant 0 : index
    %0 = vector.load %arg2[%c0, %c0_0] : memref<64x16xf32, #tpu.memory_space<vmem>>, vector<64x16xf32>
    %1 = arith.truncf %0 : vector<64x16xf32> to vector<64x16xbf16>
    %c0_1 = arith.constant 0 : index
    %c0_2 = arith.constant 0 : index
    %2 = vector.load %arg3[%c0_1, %c0_2] : memref<16x128xbf16, #tpu.memory_space<vmem>>, vector<16x128xbf16>
    %cst = arith.constant dense<0.000000e+00> : vector<64x128xf32>
    %3 = tpu.matmul %1, %2, %cst {dimension_numbers = #tpu.dot_dimension_numbers<[1], [0], [0], [1], [0, 0, 1, 1], [], []>} : vector<64x16xbf16>, vector<16x128xbf16>, vector<64x128xf32> -> vector<64x128xf32>
    %c0_3 = arith.constant 0 : index
    %c0_4 = arith.constant 0 : index
    %4 = vector.load %arg4[%c0_3, %c0_4] : memref<1x128xf32, #tpu.memory_space<vmem>>, vector<1x128xf32>
    %5 = vector.broadcast %4 : vector<1x128xf32> to vector<64x128xf32>
    %6 = arith.addf %3, %5 : vector<64x128xf32>
    %cst_5 = arith.constant 0.000000e+00 : f32
    %7 = vector.broadcast %cst_5 : f32 to vector<64x128xf32>
    %8 = arith.maximumf %6, %7 : vector<64x128xf32>
    %9 = arith.truncf %8 : vector<64x128xf32> to vector<64x128xbf16>
    %c0_6 = arith.constant 0 : index
    %c0_7 = arith.constant 0 : index
    %10 = vector.load %arg5[%c0_6, %c0_7] : memref<128x128xbf16, #tpu.memory_space<vmem>>, vector<128x128xbf16>
    %cst_8 = arith.constant dense<0.000000e+00> : vector<64x128xf32>
    %11 = tpu.matmul %9, %10, %cst_8 {dimension_numbers = #tpu.dot_dimension_numbers<[1], [0], [0], [1], [0, 0, 1, 1], [], []>} : vector<64x128xbf16>, vector<128x128xbf16>, vector<64x128xf32> -> vector<64x128xf32>
    %c0_9 = arith.constant 0 : index
    %c0_10 = arith.constant 0 : index
    %12 = vector.load %arg6[%c0_9, %c0_10] : memref<1x128xf32, #tpu.memory_space<vmem>>, vector<1x128xf32>
    %13 = vector.broadcast %12 : vector<1x128xf32> to vector<64x128xf32>
    %14 = arith.addf %11, %13 : vector<64x128xf32>
    %15 = arith.negf %14 : vector<64x128xf32>
    %16 = math.exp %15 : vector<64x128xf32>
    %cst_11 = arith.constant 1.000000e+00 : f32
    %17 = vector.broadcast %cst_11 : f32 to vector<64x128xf32>
    %18 = arith.addf %17, %16 : vector<64x128xf32>
    %19 = arith.divf %17, %18 : vector<64x128xf32>
    %c0_12 = arith.constant 0 : index
    %c0_13 = arith.constant 0 : index
    %20 = vector.load %arg7[%c0_12, %c0_13] : memref<64x128xf32, #tpu.memory_space<vmem>>, vector<64x128xf32>
    tpu.vector_store %arg7[%c0_12, %c0_13], %19 {strides = array<i32>} : memref<64x128xf32, #tpu.memory_space<vmem>>, vector<64x128xf32>,
    return
  }
  func.func @transform_0(%arg0: i32, %arg1: i32) -> (i32, i32) {
    %c0_i32 = arith.constant 0 : i32
    %c0_i32_0 = arith.constant 0 : i32
    return %arg0, %c0_i32 : i32, i32
  }
  func.func @transform_1(%arg0: i32, %arg1: i32) -> (i32, i32) {
    %c0_i32 = arith.constant 0 : i32
    %c0_i32_0 = arith.constant 0 : i32
    %c0_i32_1 = arith.constant 0 : i32
    return %c0_i32, %c0_i32_0 : i32, i32
  }
  func.func @transform_2(%arg0: i32, %arg1: i32) -> (i32, i32) {
    %c0_i32 = arith.constant 0 : i32
    %c0_i32_0 = arith.constant 0 : i32
    %c0_i32_1 = arith.constant 0 : i32
    return %c0_i32, %c0_i32_0 : i32, i32
  }
  func.func @transform_3(%arg0: i32, %arg1: i32) -> (i32, i32) {
    %c0_i32 = arith.constant 0 : i32
    %c0_i32_0 = arith.constant 0 : i32
    return %c0_i32, %arg1 : i32, i32
  }
  func.func @transform_4(%arg0: i32, %arg1: i32) -> (i32, i32) {
    %c0_i32 = arith.constant 0 : i32
    %c0_i32_0 = arith.constant 0 : i32
    return %c0_i32, %arg1 : i32, i32
  }
  func.func @transform_5(%arg0: i32, %arg1: i32) -> (i32, i32) {
    %c0_i32 = arith.constant 0 : i32
    return %arg0, %arg1 : i32, i32
  }
}

</mosaic_0001>

<bundles_post_ra>
// kernel: tpu_custom_call.1
= control target key start
LH: loop header
LB: loop body
LE: loop exit
PB: predicated region body
PF: predicated region fallthrough
CT: control target
= control target key end

     0   :  { %vm46_vm0 = vcmask 130048   ;;  %s625_s0 = inlined_call_operand.vmem [shape: f32[64,16], index: 0, kind: input, shape index: {}]   ;;  %s626_s1 = inlined_call_operand.vmem [shape: bf16[16,128], index: 1, kind: input, shape index: {}]   ;;  %s627_s2 = inlined_call_operand.vmem [shape: f32[1,128], index: 2, kind: input, shape index: {}]   ;;  %s628_s3 = inlined_call_operand.vmem [shape: bf16[128,128], index: 3, kind: input, shape index: {}]   ;;  %s629_s4 = inlined_call_operand.vmem [shape: f32[1,128], index: 4, kind: input, shape index: {}]   ;;  %s630_s5 = inlined_call_operand.hbm [shape: f32[64,128], index: 5, kind: output, shape index: {}]  }
   0x1   :  { %v423_v0 = vld [vmem:[%s626_s1] sm:$0xff]  ;;  %v24_v1 = vld [vmem:[%s625_s0 + $0x10] sm:$0xff]  ;;  %v25_v2 = vld [vmem:[%s625_s0 + $0x18] sm:$0xff] }
   0x2   :  { %v31_v3 = vpack.c.bf16 %v25_v2, %v24_v1  ;;  %v22_v4 = vld [vmem:[%s625_s0] sm:$0xff]  ;;  %v23_v5 = vld [vmem:[%s625_s0 + $0x8] sm:$0xff]  ;;  %432 = vmatpush.bf16.msra.mxu3 %v423_v0  ;;  %66 = vmatpush.bf16.msra.mxu0 %v423_v0 }
   0x3   :  { %v30_v6 = vpack.c.bf16 %v23_v5, %v22_v4 }
   0x4   :  { %10 = vsyncpa [#allocation3], 0  ;;  %v431_v7 = vld [vmem:[%s628_s3 + $0x38] sm:$0xff]  ;;  %v430_v8 = vld [vmem:[%s628_s3 + $0x30] sm:$0xff]  ;;  %s363_s29 = sshll.u32 %s630_s5, 4  ;;  %s513_s30 = smov 128   ;;  %s364_s29 = int_to_ptr.hbm [resolvable:$true] %s363_s29 }
   0x5   :  { %380 = vmatmul.msk.bf16.vlgmr.msra.gmra.mxu3 %vm46_vm0, %v31_v3  ;;  %379 = vmatmul.msk.bf16.vlgmr.msra.gmra.mxu0 %vm46_vm0, %v30_v6  ;;  %v429_v9 = vld [vmem:[%s628_s3 + $0x28] sm:$0xff]  ;;  %v26_v10 = vld [vmem:[%s625_s0 + $0x20] sm:$0xff]  ;;  %v28_v14 = vld [vmem:[%s625_s0 + $0x30] sm:$0xff]  ;;  %s514_s6 = smov 8  }
   0x6   :  { %433 = vmatpush.bf16.msra.mxu1 %v431_v7  ;;  %168 = vmatpush.bf16.msrb.mxu0 %v431_v7  ;;  %v27_v11 = vld [vmem:[%s625_s0 + $0x28] sm:$0xff]  ;;  %v428_v12 = vld [vmem:[%s628_s3 + $0x20] sm:$0xff]  ;;  %v29_v15 = vld [vmem:[%s625_s0 + $0x38] sm:$0xff] }
   0x7   :  { %434 = vmatpush.bf16.msra.mxu2 %v431_v7  ;;  %v32_v13 = vpack.c.bf16 %v27_v11, %v26_v10  ;;  %v33_v16 = vpack.c.bf16 %v29_v15, %v28_v14  ;;  %v427_v17 = vld [vmem:[%s628_s3 + $0x18] sm:$0xff]  ;;  %v426_v18 = vld [vmem:[%s628_s3 + $0x10] sm:$0xff]  ;;  %v425_v19 = vld [vmem:[%s628_s3 + $0x8] sm:$0xff] }
   0x8   :  { %v424_v20 = vld [vmem:[%s628_s3] sm:$0xff] }
   0x9   :  { %v452_v22 = vld [vmem:[%s627_s2] ss:$0 sm:$0xff] }
   0xa   :  { %435 = vmatpush.bf16.msra.mxu1 %v430_v8  ;;  %169 = vmatpush.bf16.msrb.mxu0 %v430_v8  ;;  %v606_v50 = vld [vmem:[%s629_s4] ss:$0 sm:$0xff]  ;;  %s512_s4 = smov [#allocation2]  }
   0xb   :  { %436 = vmatpush.bf16.msra.mxu2 %v430_v8  ;;  %s361_s27 = sshll.u32 %s512_s4, 4  ;;  %s362_s27 = int_to_ptr.vmem [resolvable:$true] %s361_s27 }
   0xe   :  { %437 = vmatpush.bf16.msra.mxu1 %v429_v9  ;;  %170 = vmatpush.bf16.msrb.mxu0 %v429_v9 }
   0xf   :  { %438 = vmatpush.bf16.msra.mxu2 %v429_v9 }
  0x12   :  { %439 = vmatpush.bf16.msra.mxu1 %v428_v12  ;;  %171 = vmatpush.bf16.msrb.mxu0 %v428_v12 }
  0x13   :  { %440 = vmatpush.bf16.msra.mxu2 %v428_v12 }
  0x15   :  { %381 = vmatmul.msk.bf16.gmra.mxu3 %vm46_vm0, %v32_v13 }
  0x16   :  { %441 = vmatpush.bf16.msra.mxu1 %v427_v17  ;;  %172 = vmatpush.bf16.msrb.mxu0 %v427_v17 }
  0x17   :  { %442 = vmatpush.bf16.msra.mxu2 %v427_v17 }
  0x1a   :  { %443 = vmatpush.bf16.msra.mxu1 %v426_v18  ;;  %173 = vmatpush.bf16.msrb.mxu0 %v426_v18 }
  0x1b   :  { %444 = vmatpush.bf16.msra.mxu2 %v426_v18 }
  0x1e   :  { %445 = vmatpush.bf16.msra.mxu1 %v425_v19  ;;  %174 = vmatpush.bf16.msrb.mxu0 %v425_v19 }
  0x1f   :  { %446 = vmatpush.bf16.msra.mxu2 %v425_v19 }
  0x22   :  { %447 = vmatpush.bf16.msra.mxu1 %v424_v20  ;;  %175 = vmatpush.bf16.msrb.mxu0 %v424_v20 }
  0x23   :  { %448 = vmatpush.bf16.msra.mxu2 %v424_v20 }
  0x25   :  { %382 = vmatmul.msk.bf16.gmra.mxu3 %vm46_vm0, %v33_v16 }
  0x82   :  { %v68_v21 = vpop.f32.mrf.mxu0 }
  0x83   :  { %v69_v23 = vadd.f32 %v452_v22, %v68_v21 }
  0x85   :  { %v88_v26 = vmax.f32 %v69_v23, 0.0 }
  0x88   :  { %v73_v24 = vpop.f32.mrf.mxu3 }
  0x89   :  { %v74_v29 = vadd.f32 %v452_v22, %v73_v24 }
  0x8a   :  { %v70_v25 = vpop.f32.mrf.mxu0 }
  0x8b   :  { %v71_v27 = vadd.f32 %v452_v22, %v70_v25  ;;  %v90_v33 = vmax.f32 %v74_v29, 0.0 }
  0x8d   :  { %v89_v28 = vmax.f32 %v71_v27, 0.0 }
  0x8f   :  { %v96_v30 = vpack.c.bf16 %v89_v28, %v88_v26 }
  0x90   :  { %v75_v31 = vpop.f32.mrf.mxu3 }
  0x91   :  { %v76_v32 = vadd.f32 %v452_v22, %v75_v31  ;;  %176 = vmatmul.bf16.vlgmr.msrb.gmra.mxu0 %v96_v30 }
  0x93   :  { %v91_v34 = vmax.f32 %v76_v32, 0.0 }
  0x95   :  { %v97_v35 = vpack.c.bf16 %v91_v34, %v90_v33 }
  0x97   :  { %181 = vmatmul.bf16.vlgmr.msra.gmra.mxu1 %v97_v35 }
  0x98   :  { %v78_v36 = vpop.f32.mrf.mxu3 }
  0x99   :  { %v79_v37 = vadd.f32 %v452_v22, %v78_v36 }
  0x9b   :  { %v92_v40 = vmax.f32 %v79_v37, 0.0 }
  0xa0   :  { %v80_v38 = vpop.f32.mrf.mxu3 }
  0xa1   :  { %v81_v39 = vadd.f32 %v452_v22, %v80_v38 }
  0xa3   :  { %v93_v41 = vmax.f32 %v81_v39, 0.0 }
  0xa5   :  { %v98_v42 = vpack.c.bf16 %v93_v41, %v92_v40 }
  0xa7   :  { %186 = vmatmul.bf16.vlgmr.msra.gmra.mxu2 %v98_v42 }
  0xa8   :  { %v83_v43 = vpop.f32.mrf.mxu3 }
  0xa9   :  { %v84_v44 = vadd.f32 %v452_v22, %v83_v43 }
  0xab   :  { %v94_v47 = vmax.f32 %v84_v44, 0.0 }
  0xb0   :  { %v85_v45 = vpop.f32.mrf.mxu3 }
  0xb1   :  { %v86_v46 = vadd.f32 %v452_v22, %v85_v45 }
  0xb3   :  { %v95_v48 = vmax.f32 %v86_v46, 0.0 }
  0xb5   :  { %v99_v49 = vpack.c.bf16 %v95_v48, %v94_v47 }
  0xb7   :  { %191 = vmatmul.bf16.gmra.mxu2 %v99_v49 }
 0x10e   :  { %v177_v51 = vpop.f32.mrf.mxu0 }
 0x10f   :  { %v178_v52 = vadd.f32 %v606_v50, %v177_v51 }
 0x111   :  { %v415_v53 = vmul.f32 -1.442695, %v178_v52 }
 0x113   :  { %454 = vpow2.f32 %v415_v53 }
 0x114   :  { %v182_v54 = vpop.f32.mrf.mxu1 }
 0x115   :  { %v183_v55 = vadd.f32 %v606_v50, %v182_v54 }
 0x116   :  { %v179_v56 = vpop.f32.mrf.mxu0 }
 0x117   :  { %v417_v57 = vmul.f32 -1.442695, %v183_v55  ;;  %v180_v58 = vadd.f32 %v606_v50, %v179_v56 }
 0x119   :  { %v455_v59 = vpop.eup %454  ;;  %456 = vpow2.f32 %v417_v57  ;;  %v416_v60 = vmul.f32 -1.442695, %v180_v58 }
 0x11a   :  { %v221_v61 = vadd.f32 1.0, %v455_v59 }
 0x11b   :  { %458 = vpow2.f32 %v416_v60 }
 0x11c   :  { %v184_v62 = vpop.f32.mrf.mxu1  ;;  %460 = vrcp.f32 %v221_v61  ;;  %vm234_vm1 = vweird.f32 %v221_v61  ;;  %v240_v7 = vand.u32 2147483648, %v221_v61  ;;  %v238_v9 = vand.u32 2147483647, %v221_v61 }
 0x11d   :  { %v185_v63 = vadd.f32 %v606_v50, %v184_v62 }
 0x11e   :  { %v241_v14 = vor.u32 1.1754944e-38, %v240_v7  ;;  %vm239_vm4 = vcmp.eq.f32.partialorder %v238_v9, 8.507059e+37 }
 0x11f   :  { %v457_v0 = vpop.eup %456  ;;  %v418_v1 = vmul.f32 -1.442695, %v185_v63 }
 0x120   :  { %v223_v2 = vadd.f32 1.0, %v457_v0 }
 0x121   :  { %v459_v3 = vpop.eup %458  ;;  %462 = vpow2.f32 %v418_v1 }
 0x122   :  { %v461_v4 = vpop.eup %460  ;;  %464 = vrcp.f32 %v223_v2  ;;  %v222_v6 = vadd.f32 1.0, %v459_v3  ;;  %v268_v22 = vand.u32 2147483647, %v223_v2  ;;  %v270_v23 = vand.u32 2147483648, %v223_v2 }
 0x123   :  { %v230_v5 = vmul.f32 %v461_v4, %v221_v61  ;;  %vm235_vm2 = vweird.f32 %v461_v4  ;;  %vm264_vm8 = vweird.f32 %v223_v2 }
 0x124   :  { %466 = vrcp.f32 %v222_v6  ;;  %vm236_vm3 = vmor %vm234_vm1, %vm235_vm2  ;;  %v255_v27 = vand.u32 2147483648, %v222_v6  ;;  %vm249_vm6 = vweird.f32 %v222_v6  ;;  %v253_v30 = vand.u32 2147483647, %v222_v6 }
 0x125   :  { %v231_v8 = vsub.f32 1.0, %v230_v5  ;;  %v271_v33 = vor.u32 1.1754944e-38, %v270_v23  ;;  %vm269_vm10 = vcmp.eq.f32.partialorder %v268_v22, 8.507059e+37 }
 0x126   :  { %v256_v38 = vor.u32 1.1754944e-38, %v255_v27  ;;  %vm254_vm12 = vcmp.eq.f32.partialorder %v253_v30, 8.507059e+37 }
 0x127   :  { %v463_v10 = vpop.eup %462  ;;  %v232_v11 = vmul.f32 %v461_v4, %v231_v8 }
 0x128   :  { %v465_v12 = vpop.eup %464  ;;  %v224_v13 = vadd.f32 1.0, %v463_v10 }
 0x129   :  { %v260_v15 = vmul.f32 %v465_v12, %v223_v2  ;;  %v233_v16 = vadd.f32 %v461_v4, %v232_v11  ;;  %vm265_vm5 = vweird.f32 %v465_v12 }
 0x12a   :  { %468 = vrcp.f32 %v224_v13  ;;  %v187_v17 = vpop.f32.mrf.mxu2  ;;  %v467_v18 = vpop.eup %466  ;;  %vm266_vm9 = vmor %vm264_vm8, %vm265_vm5  ;;  %v283_v44 = vand.u32 2147483647, %v224_v13  ;;  %v285_v45 = vand.u32 2147483648, %v224_v13  ;;  %vm279_vm14 = vweird.f32 %v224_v13 }
 0x12b   :  { %v261_v19 = vsub.f32 1.0, %v260_v15  ;;  %v237_v20 = vsel %vm236_vm3, %v461_v4, %v233_v16  ;;  %v188_v21 = vadd.f32 %v606_v50, %v187_v17  ;;  %v245_v25 = vmul.f32 %v467_v18, %v222_v6 }
 0x12c   :  { %v242_v24 = vsel %vm239_vm4, %v241_v14, %v237_v20  ;;  %vm250_vm7 = vweird.f32 %v467_v18  ;;  %v286_v54 = vor.u32 1.1754944e-38, %v285_v45  ;;  %vm284_vm0 = vcmp.eq.f32.partialorder %v283_v44, 8.507059e+37 }
 0x12d   :  { %v262_v26 = vmul.f32 %v465_v12, %v261_v19  ;;  %349 = vst [vmem:[#allocation2] sm:$0xff] %v242_v24  ;;  %v419_v28 = vmul.f32 -1.442695, %v188_v21  ;;  %v246_v29 = vsub.f32 1.0, %v245_v25  ;;  %vm613_vm11 = vmor %vm249_vm6, %vm250_vm7 }
 0x12f   :  { %v263_v31 = vadd.f32 %v465_v12, %v262_v26  ;;  %470 = vpow2.f32 %v419_v28  ;;  %v247_v34 = vmul.f32 %v467_v18, %v246_v29 }
 0x130   :  { %v469_v32 = vpop.eup %468 }
 0x131   :  { %v267_v35 = vsel %vm266_vm9, %v465_v12, %v263_v31  ;;  %v275_v36 = vmul.f32 %v469_v32, %v224_v13  ;;  %v248_v40 = vadd.f32 %v467_v18, %v247_v34  ;;  %vm280_vm13 = vweird.f32 %v469_v32 }
 0x132   :  { %v272_v39 = vsel %vm269_vm10, %v271_v33, %v267_v35  ;;  %v189_v41 = vpop.f32.mrf.mxu2  ;;  %vm281_vm15 = vmor %vm279_vm14, %vm280_vm13 }
 0x133   :  { %351 = vst [vmem:[#allocation2 + $0x10] sm:$0xff] %v272_v39  ;;  %v276_v42 = vsub.f32 1.0, %v275_v36  ;;  %v190_v43 = vadd.f32 %v606_v50, %v189_v41  ;;  %v252_v46 = vsel %vm613_vm11, %v467_v18, %v248_v40 }
 0x134   :  { %v257_v49 = vsel %vm254_vm12, %v256_v38, %v252_v46 }
 0x135   :  { %v471_v47 = vpop.eup %470  ;;  %v277_v48 = vmul.f32 %v469_v32, %v276_v42  ;;  %v420_v51 = vmul.f32 -1.442695, %v190_v43  ;;  %350 = vst [vmem:[#allocation2 + $0x8] sm:$0xff] %v257_v49 }
 0x136   :  { %v225_v52 = vadd.f32 1.0, %v471_v47 }
 0x137   :  { %v278_v53 = vadd.f32 %v469_v32, %v277_v48  ;;  %472 = vpow2.f32 %v420_v51 }
 0x138   :  { %474 = vrcp.f32 %v225_v52  ;;  %v300_v1 = vand.u32 2147483648, %v225_v52  ;;  %v298_v4 = vand.u32 2147483647, %v225_v52  ;;  %vm294_vm2 = vweird.f32 %v225_v52 }
 0x139   :  { %v282_v55 = vsel %vm281_vm15, %v469_v32, %v278_v53 }
 0x13a   :  { %v287_v56 = vsel %vm284_vm0, %v286_v54, %v282_v55  ;;  %v192_v57 = vpop.f32.mrf.mxu2  ;;  %v301_v10 = vor.u32 1.1754944e-38, %v300_v1  ;;  %vm299_vm4 = vcmp.eq.f32.partialorder %v298_v4, 8.507059e+37 }
 0x13b   :  { %352 = vst [vmem:[#allocation2 + $0x18] sm:$0xff] %v287_v56  ;;  %v193_v58 = vadd.f32 %v606_v50, %v192_v57 }
 0x13d   :  { %v473_v59 = vpop.eup %472  ;;  %v421_v60 = vmul.f32 -1.442695, %v193_v58 }
 0x13e   :  { %v475_v61 = vpop.eup %474  ;;  %v226_v62 = vadd.f32 1.0, %v473_v59 }
 0x13f   :  { %v290_v63 = vmul.f32 %v475_v61, %v225_v52  ;;  %476 = vpow2.f32 %v421_v60  ;;  %vm295_vm1 = vweird.f32 %v475_v61 }
 0x140   :  { %478 = vrcp.f32 %v226_v62  ;;  %vm296_vm3 = vmor %vm294_vm2, %vm295_vm1  ;;  %v315_v16 = vand.u32 2147483648, %v226_v62  ;;  %vm309_vm6 = vweird.f32 %v226_v62 }
 0x141   :  { %v291_v0 = vsub.f32 1.0, %v290_v63 }
 0x142   :  { %v194_v2 = vpop.f32.mrf.mxu2  ;;  %v316_v21 = vor.u32 1.1754944e-38, %v315_v16 }
 0x143   :  { %v292_v3 = vmul.f32 %v475_v61, %v291_v0  ;;  %v195_v5 = vadd.f32 %v606_v50, %v194_v2  ;;  %v313_v50 = vand.u32 2147483647, %v226_v62 }
 0x145   :  { %v477_v6 = vpop.eup %476  ;;  %v293_v7 = vadd.f32 %v475_v61, %v292_v3  ;;  %v422_v8 = vmul.f32 -1.442695, %v195_v5  ;;  %vm314_vm8 = vcmp.eq.f32.partialorder %v313_v50, 8.507059e+37 }
 0x146   :  { %v479_v9 = vpop.eup %478  ;;  %v227_v11 = vadd.f32 1.0, %v477_v6 }
 0x147   :  { %v297_v12 = vsel %vm296_vm3, %v475_v61, %v293_v7  ;;  %v305_v13 = vmul.f32 %v479_v9, %v226_v62  ;;  %480 = vpow2.f32 %v422_v8  ;;  %vm310_vm5 = vweird.f32 %v479_v9 }
 0x148   :  { %v302_v14 = vsel %vm299_vm4, %v301_v10, %v297_v12  ;;  %482 = vrcp.f32 %v227_v11  ;;  %vm311_vm7 = vmor %vm309_vm6, %vm310_vm5  ;;  %v330_v27 = vand.u32 2147483648, %v227_v11  ;;  %v328_v29 = vand.u32 2147483647, %v227_v11 }
 0x149   :  { %353 = vst [vmem:[#allocation2 + $0x20] sm:$0xff] %v302_v14  ;;  %v306_v15 = vsub.f32 1.0, %v305_v13  ;;  %vm324_vm10 = vweird.f32 %v227_v11 }
 0x14a   :  { %v331_v32 = vor.u32 1.1754944e-38, %v330_v27  ;;  %vm329_vm12 = vcmp.eq.f32.partialorder %v328_v29, 8.507059e+37 }
 0x14b   :  { %v307_v17 = vmul.f32 %v479_v9, %v306_v15 }
 0x14d   :  { %v481_v18 = vpop.eup %480  ;;  %v308_v19 = vadd.f32 %v479_v9, %v307_v17 }
 0x14e   :  { %v483_v20 = vpop.eup %482  ;;  %v228_v22 = vadd.f32 1.0, %v481_v18 }
 0x14f   :  { %v312_v23 = vsel %vm311_vm7, %v479_v9, %v308_v19  ;;  %v320_v24 = vmul.f32 %v483_v20, %v227_v11  ;;  %vm325_vm9 = vweird.f32 %v483_v20 }
 0x150   :  { %v317_v25 = vsel %vm314_vm8, %v316_v21, %v312_v23  ;;  %484 = vrcp.f32 %v228_v22  ;;  %vm326_vm11 = vmor %vm324_vm10, %vm325_vm9  ;;  %v345_v37 = vand.u32 2147483648, %v228_v22  ;;  %v343_v39 = vand.u32 2147483647, %v228_v22 }
 0x151   :  { %354 = vst [vmem:[#allocation2 + $0x28] sm:$0xff] %v317_v25  ;;  %v321_v26 = vsub.f32 1.0, %v320_v24  ;;  %vm339_vm14 = vweird.f32 %v228_v22 }
 0x152   :  { %v346_v41 = vor.u32 1.1754944e-38, %v345_v37  ;;  %vm344_vm0 = vcmp.eq.f32.partialorder %v343_v39, 8.507059e+37 }
 0x153   :  { %v322_v28 = vmul.f32 %v483_v20, %v321_v26 }
 0x155   :  { %v323_v30 = vadd.f32 %v483_v20, %v322_v28 }
 0x156   :  { %v485_v31 = vpop.eup %484 }
 0x157   :  { %v327_v33 = vsel %vm326_vm11, %v483_v20, %v323_v30  ;;  %v335_v34 = vmul.f32 %v485_v31, %v228_v22  ;;  %vm340_vm13 = vweird.f32 %v485_v31 }
 0x158   :  { %v332_v35 = vsel %vm329_vm12, %v331_v32, %v327_v33  ;;  %vm341_vm15 = vmor %vm339_vm14, %vm340_vm13 }
 0x159   :  { %355 = vst [vmem:[#allocation2 + $0x30] sm:$0xff] %v332_v35  ;;  %v336_v36 = vsub.f32 1.0, %v335_v34 }
 0x15b   :  { %v337_v38 = vmul.f32 %v485_v31, %v336_v36 }
 0x15d   :  { %v338_v40 = vadd.f32 %v485_v31, %v337_v38 }
 0x15f   :  { %v342_v42 = vsel %vm341_vm15, %v485_v31, %v338_v40 }
 0x160   :  { %v347_v43 = vsel %vm344_vm0, %v346_v41, %v342_v42 }
 0x161   :  { %356 = vst [vmem:[#allocation2 + $0x38] sm:$0xff] %v347_v43 }
 0x162   :  { %369 = dma.vmem_to_hbm [thread:$0]  %s362_s27, 1024, %s364_s29, [#allocation3], %s513_s30, %s513_s30, %s514_s6  }
 0x163   :  { %510 = dma.done.wait [#allocation3], 1024  }
 0x164   :  { %511 = vsyncadd [#allocation3], 4294966272 }
 0x165   :  { %374 = vsyncpa [#allocation3], 1 }

</bundles_post_ra>
